<compile_context>
chip_gen: v6e
topology: v6e:2x2x1
jax: 0.10.0
libtpu: 0.0.40
codegen_flags: <defaults>
</compile_context>

<pallas_src>
import math

import jax
import jax.numpy as jnp
from jax import lax
from jax.experimental import pallas as pl
from jax.experimental.pallas import tpu as pltpu

RMS_EPS = float(jnp.finfo(jnp.float32).eps)  # nn.RMSNorm(eps=None) -> float32 eps
OUT_LANES = 128                              # lane-dense output padding


# ----------------------------------------------------------------------------
# Glue: sinusoidal position embedding (SinusoidalPosEmb)
# ----------------------------------------------------------------------------
def sinusoidal_pos_emb(x, dim, theta=10000.0):
    half = dim // 2
    emb = math.log(theta) / (half - 1)
    freqs = jnp.exp(jnp.arange(half, dtype=jnp.float32) * -emb)
    arg = x.astype(jnp.float32)[:, None] * freqs[None, :]
    return jnp.concatenate([jnp.sin(arg), jnp.cos(arg)], axis=-1)


def _rms_norm(x, w, eps):
    ms = jnp.mean(x * x, axis=-1, keepdims=True)
    return x * lax.rsqrt(ms + eps) * w


# ----------------------------------------------------------------------------
# Kernel 1: in_mlp  (Linear -> ReLU -> Linear) + t-embed add
# ----------------------------------------------------------------------------
def _in_mlp_kernel(x_ref, temb_ref, w1_ref, b1_ref, w2_ref, b2_ref, o_ref):
    f32, bf16 = jnp.float32, jnp.bfloat16
    BB, T, din = x_ref.shape
    H = o_ref.shape[-1]
    x = x_ref[...].reshape(BB * T, din).astype(bf16)
    h = jnp.dot(x, w1_ref[...], preferred_element_type=f32) + b1_ref[...]
    h = jnp.maximum(h, 0.0)
    h = jnp.dot(h.astype(bf16), w2_ref[...], preferred_element_type=f32) + b2_ref[...]
    o_ref[...] = h.reshape(BB, T, H) + temb_ref[...][None]


# ----------------------------------------------------------------------------
# Kernel 2: the attention-layer stack.  grid = (batch_block, layer)
#   layer weights are streamed per grid step; hidden state carried in scratch.
# ----------------------------------------------------------------------------
def _make_layer_kernel(BB, T, H, NH):
    HD = H // NH
    M = BB * T
    f32, bf16 = jnp.float32, jnp.bfloat16

    def kernel(h0_ref, qkvw_ref, qkvb_ref, ow_ref, ob_ref,
               ln1_ref, ln2_ref, ffw1_ref, ffb1_ref, ffw2_ref, ffb2_ref,
               o_ref, h_ref):
        l = pl.program_id(1)

        # load the in_mlp output into the carried hidden state on the first layer
        @pl.when(l == 0)
        def _():
            h_ref[...] = h0_ref[...]

        h = h_ref[...].reshape(M, H)                               # (BB*T, H) f32

        # ---- fused q/k/v projection (qkv Linear + mha in_proj + softmax scale
        #      folded host-side): one lane-dense (M,H)@(H,3H) MXU matmul -------
        qkv = (jnp.dot(h.astype(bf16), qkvw_ref[...],
                       preferred_element_type=f32) + qkvb_ref[...]).astype(bf16)

        # ---- scaled dot-product attention, per head (batch-leading einsums;
        #      head split uses only lane slices + leading-dim reshapes) --------
        # TODO(synk): attention-weight dropout (p=0.6) omitted (eval semantics);
        #             the module never forwards `mask` to mha, so no masking.
        o_heads = []
        for n in range(NH):
            qn = qkv[:, n * HD:(n + 1) * HD].reshape(BB, T, HD)
            kn = qkv[:, H + n * HD:H + (n + 1) * HD].reshape(BB, T, HD)
            vn = qkv[:, 2 * H + n * HD:2 * H + (n + 1) * HD].reshape(BB, T, HD)
            s = jnp.einsum("btd,bsd->bts", qn, kn, preferred_element_type=f32)
            s = s - jnp.max(s, axis=-1, keepdims=True)
            p = jnp.exp(s)
            p = p * pl.reciprocal(jnp.sum(p, axis=-1, keepdims=True), approx=True)
            on = jnp.einsum("bts,bsd->btd", p.astype(bf16), vn,
                            preferred_element_type=f32)            # (BB, T, HD)
            o_heads.append(on.reshape(M, HD))

        # concat heads on lanes -> the out-projection + head reduction fuse into
        # ONE K=H matmul (no per-head partial sums, no (NH,T,H) f32 intermediate)
        o_cat = jnp.concatenate(o_heads, axis=-1).astype(bf16)     # (M, H)
        attn = jnp.dot(o_cat, ow_ref[...], preferred_element_type=f32) + ob_ref[...]

        h1 = _rms_norm(h + attn, ln1_ref[...], RMS_EPS)

        # ---- feed-forward: Linear -> SiLU -> Linear -------------------------
        f = jnp.dot(h1.astype(bf16), ffw1_ref[...],
                    preferred_element_type=f32) + ffb1_ref[...]
        f = f * jax.nn.sigmoid(f)
        f = jnp.dot(f.astype(bf16), ffw2_ref[...],
                    preferred_element_type=f32) + ffb2_ref[...]

        h2 = _rms_norm(h1 + f, ln2_ref[...], RMS_EPS)
        h_ref[...] = h2.reshape(BB, T, H)

        @pl.when(l == pl.num_programs(1) - 1)
        def _():
            o_ref[...] = h2.reshape(BB, T, H)

    return kernel


# ----------------------------------------------------------------------------
# Kernel 3: out_mlp, lane-padded to 128 output lanes for an unmasked store.
# ----------------------------------------------------------------------------
def _out_mlp_kernel(h_ref, w_ref, b_ref, o_ref):
    f32, bf16 = jnp.float32, jnp.bfloat16
    BB, T, H = h_ref.shape
    y = jnp.dot(h_ref[...].reshape(BB * T, H).astype(bf16), w_ref[...],
                preferred_element_type=f32) + b_ref[...]
    o_ref[...] = y.reshape(BB, T, o_ref.shape[-1])


# ----------------------------------------------------------------------------
# Host-side weight preparation
# ----------------------------------------------------------------------------
def _prepare_layer_params(params, H, NH):
    """Fold qkv Linear + mha in_proj (+ softmax scale) into one (H, 3H) weight."""
    HD = H // NH
    scale = 1.0 / math.sqrt(HD)
    bf16, f32 = jnp.bfloat16, jnp.float32

    qkv_w, qkv_b = params["qkv_w"], params["qkv_b"]    # (L,H,3H), (L,1,3H)
    wi, bi = params["mha_in_w"], params["mha_in_b"]    # (L,H,3H), (L,1,3H)

    w_parts, b_parts = [], []
    for c in range(3):                                 # q, k, v chunks
        sl = slice(c * H, (c + 1) * H)
        w_eff = jnp.einsum("lij,ljk->lik", qkv_w[:, :, sl], wi[:, :, sl])
        b_eff = jnp.einsum("lij,ljk->lik", qkv_b[:, :, sl], wi[:, :, sl]) + bi[:, :, sl]
        if c == 0:                                     # fold 1/sqrt(HD) into q
            w_eff = w_eff * scale
            b_eff = b_eff * scale
        w_parts.append(w_eff)
        b_parts.append(b_eff)

    return dict(
        qkvw=jnp.concatenate(w_parts, axis=-1).astype(bf16),   # (L, H, 3H)
        qkvb=jnp.concatenate(b_parts, axis=-1).astype(f32),    # (L, 1, 3H) lane-dense
        ow=params["mha_out_w"].astype(bf16),                   # (L, H, H)
        ob=params["mha_out_b"].astype(f32),                    # (L, 1, H)
        ln1=params["ln1_w"].astype(f32), ln2=params["ln2_w"].astype(f32),
        ff_w1=params["ff_w1"].astype(bf16), ff_b1=params["ff_b1"].astype(f32),
        ff_w2=params["ff_w2"].astype(bf16), ff_b2=params["ff_b2"].astype(f32),
    )


def _pick_batch_block(B, T, max_rows=512):
    """Largest batch block keeping ~max_rows matmul rows and >=2 grid blocks."""
    bb = max(1, min(B, max_rows // max(T, 1)))
    if B >= 2:
        bb = max(1, min(bb, B // 2))   # keep both v7x TensorCores fed
    while B % bb:
        bb -= 1
    return max(bb, 1)


def _layer_vmem_limit_bytes(BB, T, H, DFF, NH):
    """Per-generation VMEM budget (instead of a hard-coded 32 MiB)."""
    M = BB * T
    per_layer_w = 2 * (3 * H * H + H * H + 2 * H * DFF)       # bf16 streamed weights
    per_layer_b = 4 * (3 * H + 4 * H + DFF)                   # f32 bias / rmsnorm rows
    io_blocks = 2 * 2 * 4 * M * H                             # h0 + h_out, double buffered
    scratch = 4 * M * H
    activ = 4 * (3 * M * H + 2 * M * DFF + 2 * BB * T * T + 6 * M * H)
    need = 2 * (per_layer_w + per_layer_b) + io_blocks + scratch + activ
    try:
        cap = pltpu.get_tpu_info().vmem_capacity_bytes        # 64 MiB v7x, 128 MiB v5e/v6e
    except Exception:
        cap = 64 * 1024 * 1024                                # v7x-safe fallback
    return int(min(0.85 * cap, max(need + (2 << 20), 16 << 20)))


# ----------------------------------------------------------------------------
# Wrapper
# ----------------------------------------------------------------------------
def transformer_forward(params, x, noise_levels, external_cond,
                        hidden, num_layers, nhead):
    B, T, x_dim = x.shape
    H, NH, L = hidden, nhead, num_layers
    DFF = params["ff_w1"].shape[-1]
    f32, bf16 = jnp.float32, jnp.bfloat16

    # SinusoidalPosEmb(k) on flattened noise levels -> (B, T, H//2)
    k_emb = sinusoidal_pos_emb(noise_levels.reshape(-1), H // 2).reshape(B, T, H // 2)
    xin = jnp.concatenate([x.astype(f32), k_emb, external_cond.astype(f32)], axis=-1)
    din = xin.shape[-1]
    # SinusoidalPosEmb(t) on arange(T) -> (T, H), broadcast over batch in-kernel
    t_emb = sinusoidal_pos_emb(jnp.arange(T), H)

    BB = _pick_batch_block(B, T)
    NB = B // BB

    # ---------------- 1) in_mlp + t-embed --------------------------------------
    h0 = pl.pallas_call(
        _in_mlp_kernel,
        out_shape=jax.ShapeDtypeStruct((B, T, H), f32),
        grid=(NB,),
        in_specs=[
            pl.BlockSpec((BB, T, din), lambda b: (b, 0, 0)),
            pl.BlockSpec((T, H), lambda b: (0, 0)),
            pl.BlockSpec((din, H), lambda b: (0, 0)),
            pl.BlockSpec((1, H), lambda b: (0, 0)),
            pl.BlockSpec((H, H), lambda b: (0, 0)),
            pl.BlockSpec((1, H), lambda b: (0, 0)),
        ],
        out_specs=pl.BlockSpec((BB, T, H), lambda b: (b, 0, 0)),
        compiler_params=pltpu.CompilerParams(dimension_semantics=("parallel",)),
    )(xin, t_emb,
      params["in_w1"].astype(bf16), params["in_b1"].astype(f32),
      params["in_w2"].astype(bf16), params["in_b2"].astype(f32))

    # ---------------- 2) attention layer stack ---------------------------------
    kp = _prepare_layer_params(params, H, NH)
    layer_kernel = _make_layer_kernel(BB, T, H, NH)

    def wspec(shape):  # per-layer weight: leading layer dim squeezed, streamed
        return pl.BlockSpec((None,) + shape, lambda b, l: (l, 0, 0))

    hL = pl.pallas_call(
        layer_kernel,
        out_shape=jax.ShapeDtypeStruct((B, T, H), f32),
        grid=(NB, L),
        in_specs=[
            pl.BlockSpec((BB, T, H), lambda b, l: (b, 0, 0)),    # h0 (fetched once per b)
            wspec((H, 3 * H)), wspec((1, 3 * H)),                # fused qkv (lane-dense)
            wspec((H, H)), wspec((1, H)),                        # mha out-projection
            wspec((1, H)), wspec((1, H)),                        # rmsnorm weights
            wspec((H, DFF)), wspec((1, DFF)),                    # feed-forward 1
            wspec((DFF, H)), wspec((1, H)),                      # feed-forward 2
        ],
        out_specs=pl.BlockSpec((BB, T, H), lambda b, l: (b, 0, 0)),
        scratch_shapes=[pltpu.VMEM((BB, T, H), f32)],            # hidden state carry
        compiler_params=pltpu.CompilerParams(
            dimension_semantics=("parallel", "arbitrary"),
            vmem_limit_bytes=_layer_vmem_limit_bytes(BB, T, H, DFF, NH)),
    )(h0, kp["qkvw"], kp["qkvb"], kp["ow"], kp["ob"], kp["ln1"], kp["ln2"],
      kp["ff_w1"], kp["ff_b1"], kp["ff_w2"], kp["ff_b2"])

    # ---------------- 3) out_mlp (lane padded) ----------------------------------
    out_lanes = max(OUT_LANES, ((x_dim + 127) // 128) * 128)
    out_w = jnp.zeros((H, out_lanes), f32).at[:, :x_dim].set(params["out_w"]).astype(bf16)
    out_b = jnp.zeros((1, out_lanes), f32).at[:, :x_dim].set(params["out_b"])

    out = pl.pallas_call(
        _out_mlp_kernel,
        out_shape=jax.ShapeDtypeStruct((B, T, out_lanes), f32),
        grid=(NB,),
        in_specs=[
            pl.BlockSpec((BB, T, H), lambda b: (b, 0, 0)),
            pl.BlockSpec((H, out_lanes), lambda b: (0, 0)),
            pl.BlockSpec((1, out_lanes), lambda b: (0, 0)),
        ],
        out_specs=pl.BlockSpec((BB, T, out_lanes), lambda b: (b, 0, 0)),
        compiler_params=pltpu.CompilerParams(dimension_semantics=("parallel",)),
    )(hL, out_w, out_b)

    return out[:, :, :x_dim]


# ----------------------------------------------------------------------------
# Deterministic parameter init (shapes from Transformer.__init__, (in,out) layout)
# ----------------------------------------------------------------------------
def init_params(key, x_dim, ext_dim, hidden, num_layers, nhead, dff):
    keys = iter(jax.random.split(key, 32))

    def w(shape, scale=0.05):
        return (scale * jax.random.normal(next(keys), shape)).astype(jnp.float32)

    din = x_dim + hidden // 2 + ext_dim
    L, H = num_layers, hidden
    return {
        "in_w1": w((din, H)), "in_b1": w((1, H)),
        "in_w2": w((H, H)),   "in_b2": w((1, H)),
        "qkv_w": w((L, H, 3 * H)),     "qkv_b": w((L, 1, 3 * H)),
        "mha_in_w": w((L, H, 3 * H)),  "mha_in_b": w((L, 1, 3 * H)),
        "mha_out_w": w((L, H, H)),     "mha_out_b": w((L, 1, H)),
        "ln1_w": jnp.ones((L, 1, H), jnp.float32),   # nn.RMSNorm default init
        "ln2_w": jnp.ones((L, 1, H), jnp.float32),
        "ff_w1": w((L, H, dff)), "ff_b1": w((L, 1, dff)),
        "ff_w2": w((L, dff, H)), "ff_b2": w((L, 1, H)),
        "out_w": w((H, x_dim)),  "out_b": w((1, x_dim)),
    }


# ----------------------------------------------------------------------------
# Pure-JAX f32 reference (mirrors the PyTorch forward) for correctness check
# ----------------------------------------------------------------------------
def transformer_reference(params, x, noise_levels, external_cond,
                          hidden, num_layers, nhead):
    B, T, x_dim = x.shape
    H, HD = hidden, hidden // nhead
    k_emb = sinusoidal_pos_emb(noise_levels.reshape(-1), H // 2).reshape(B, T, H // 2)
    h = jnp.concatenate([x, k_emb, external_cond], axis=-1)
    h = jnp.maximum(h @ params["in_w1"] + params["in_b1"], 0.0)
    h = h @ params["in_w2"] + params["in_b2"]
    h = h + sinusoidal_pos_emb(jnp.arange(T), H)[None]
    for l in range(num_layers):
        qkv = h @ params["qkv_w"][l] + params["qkv_b"][l]
        q, k, v = qkv[..., :H], qkv[..., H:2 * H], qkv[..., 2 * H:]
        wi, bi = params["mha_in_w"][l], params["mha_in_b"][l]
        qp = q @ wi[:, :H] + bi[:, :H]
        kp = k @ wi[:, H:2 * H] + bi[:, H:2 * H]
        vp = v @ wi[:, 2 * H:] + bi[:, 2 * H:]
        split = lambda a: a.reshape(B, T, nhead, HD).transpose(0, 2, 1, 3)
        qh, kh, vh = split(qp), split(kp), split(vp)
        s = jnp.einsum("bhqd,bhkd->bhqk", qh, kh) / math.sqrt(HD)
        a = jnp.einsum("bhqk,bhkd->bhqd", jax.nn.softmax(s, axis=-1), vh)
        a = a.transpose(0, 2, 1, 3).reshape(B, T, H)
        a = a @ params["mha_out_w"][l] + params["mha_out_b"][l]
        h = _rms_norm(h + a, params["ln1_w"][l], RMS_EPS)
        f = h @ params["ff_w1"][l] + params["ff_b1"][l]
        f = f * jax.nn.sigmoid(f)
        f = f @ params["ff_w2"][l] + params["ff_b2"][l]
        h = _rms_norm(h + f, params["ln2_w"][l], RMS_EPS)
    return h @ params["out_w"] + params["out_b"]


if __name__ == "__main__":
    B, T = 2, 8
    x_dim, ext_dim = 4, 3
    hidden, num_layers, nhead, dff = 32, 2, 4, 64

    key = jax.random.PRNGKey(0)
    kx, kn, kc, kpk = jax.random.split(key, 4)
    x = jax.random.normal(kx, (B, T, x_dim), jnp.float32)
    noise_levels = jax.random.randint(kn, (B, T), 0, 50)          # LongTensor analog
    external_cond = jax.random.normal(kc, (B, T, ext_dim), jnp.float32)
    params = init_params(kpk, x_dim, ext_dim, hidden, num_layers, nhead, dff)

    out = transformer_forward(params, x, noise_levels, external_cond,
                              hidden, num_layers, nhead)
    out = jax.block_until_ready(out)

    ref = transformer_reference(params, x, noise_levels, external_cond,
                                hidden, num_layers, nhead)
    assert out.shape == (B, T, x_dim)
    # bf16 matmuls + approx softmax reciprocal vs. a pure-f32 reference
    err = float(jnp.max(jnp.abs(out - ref)))
    assert bool(jnp.allclose(out, ref, rtol=2e-2, atol=2e-2)), f"max abs err {err}"
    print("KERNEL_OK")
</pallas_src>

<mosaic_0001>
module attributes {stable_mosaic.version = 11 : i64} {
  func.func @_in_mlp_kernel(%arg0: i32, %arg1: memref<1x8x23xf32, #tpu.memory_space<vmem>>, %arg2: memref<8x32xf32, #tpu.memory_space<vmem>>, %arg3: memref<23x32xbf16, #tpu.memory_space<vmem>>, %arg4: memref<1x32xf32, #tpu.memory_space<vmem>>, %arg5: memref<32x32xbf16, #tpu.memory_space<vmem>>, %arg6: memref<1x32xf32, #tpu.memory_space<vmem>>, %arg7: memref<1x8x32xf32, #tpu.memory_space<vmem>>) attributes {dimension_semantics = [#tpu.dimension_semantics<parallel>], iteration_bounds = array<i64: 2>, scalar_prefetch = 0 : i64, scratch_operands = 0 : i64, tpu.core_type = #tpu.core_type<tc>, window_params = [{transform_indices = @transform_0, window_bounds = array<i64: 1, 8, 23>}, {pipeline_mode = #tpu.pipeline_mode<synchronous>, transform_indices = @transform_1, window_bounds = array<i64: 8, 32>}, {pipeline_mode = #tpu.pipeline_mode<synchronous>, transform_indices = @transform_2, window_bounds = array<i64: 23, 32>}, {pipeline_mode = #tpu.pipeline_mode<synchronous>, transform_indices = @transform_3, window_bounds = array<i64: 1, 32>}, {pipeline_mode = #tpu.pipeline_mode<synchronous>, transform_indices = @transform_4, window_bounds = array<i64: 32, 32>}, {pipeline_mode = #tpu.pipeline_mode<synchronous>, transform_indices = @transform_5, window_bounds = array<i64: 1, 32>}, {transform_indices = @transform_6, window_bounds = array<i64: 1, 8, 32>}]} {
    %c0 = arith.constant 0 : index
    %c0_0 = arith.constant 0 : index
    %c0_1 = arith.constant 0 : index
    %0 = vector.load %arg1[%c0, %c0_0, %c0_1] : memref<1x8x23xf32, #tpu.memory_space<vmem>>, vector<1x8x23xf32>
    %1 = vector.shape_cast %0 : vector<1x8x23xf32> to vector<8x23xf32>
    %2 = arith.truncf %1 : vector<8x23xf32> to vector<8x23xbf16>
    %c0_2 = arith.constant 0 : index
    %c0_3 = arith.constant 0 : index
    %3 = vector.load %arg3[%c0_2, %c0_3] : memref<23x32xbf16, #tpu.memory_space<vmem>>, vector<23x32xbf16>
    %cst = arith.constant dense<0.000000e+00> : vector<8x32xf32>
    %4 = tpu.matmul %2, %3, %cst {dimension_numbers = #tpu.dot_dimension_numbers<[1], [0], [0], [1], [0, 0, 1, 1], [], []>} : vector<8x23xbf16>, vector<23x32xbf16>, vector<8x32xf32> -> vector<8x32xf32>
    %c0_4 = arith.constant 0 : index
    %c0_5 = arith.constant 0 : index
    %5 = vector.load %arg4[%c0_4, %c0_5] : memref<1x32xf32, #tpu.memory_space<vmem>>, vector<1x32xf32>
    %6 = vector.broadcast %5 : vector<1x32xf32> to vector<8x32xf32>
    %7 = arith.addf %4, %6 : vector<8x32xf32>
    %cst_6 = arith.constant 0.000000e+00 : f32
    %8 = vector.broadcast %cst_6 : f32 to vector<8x32xf32>
    %9 = arith.maximumf %7, %8 : vector<8x32xf32>
    %10 = arith.truncf %9 : vector<8x32xf32> to vector<8x32xbf16>
    %c0_7 = arith.constant 0 : index
    %c0_8 = arith.constant 0 : index
    %11 = vector.load %arg5[%c0_7, %c0_8] : memref<32x32xbf16, #tpu.memory_space<vmem>>, vector<32x32xbf16>
    %cst_9 = arith.constant dense<0.000000e+00> : vector<8x32xf32>
    %12 = tpu.matmul %10, %11, %cst_9 {dimension_numbers = #tpu.dot_dimension_numbers<[1], [0], [0], [1], [0, 0, 1, 1], [], []>} : vector<8x32xbf16>, vector<32x32xbf16>, vector<8x32xf32> -> vector<8x32xf32>
    %c0_10 = arith.constant 0 : index
    %c0_11 = arith.constant 0 : index
    %13 = vector.load %arg6[%c0_10, %c0_11] : memref<1x32xf32, #tpu.memory_space<vmem>>, vector<1x32xf32>
    %14 = vector.broadcast %13 : vector<1x32xf32> to vector<8x32xf32>
    %15 = arith.addf %12, %14 : vector<8x32xf32>
    %16 = vector.shape_cast %15 : vector<8x32xf32> to vector<1x8x32xf32>
    %c0_12 = arith.constant 0 : index
    %c0_13 = arith.constant 0 : index
    %17 = vector.load %arg2[%c0_12, %c0_13] : memref<8x32xf32, #tpu.memory_space<vmem>>, vector<8x32xf32>
    %18 = vector.shape_cast %17 : vector<8x32xf32> to vector<1x8x32xf32>
    %19 = arith.addf %16, %18 : vector<1x8x32xf32>
    %c0_14 = arith.constant 0 : index
    %c0_15 = arith.constant 0 : index
    %c0_16 = arith.constant 0 : index
    %20 = vector.load %arg7[%c0_14, %c0_15, %c0_16] : memref<1x8x32xf32, #tpu.memory_space<vmem>>, vector<1x8x32xf32>
    tpu.vector_store %arg7[%c0_14, %c0_15, %c0_16], %19 {strides = array<i32>} : memref<1x8x32xf32, #tpu.memory_space<vmem>>, vector<1x8x32xf32>,
    return
  }
  func.func @transform_0(%arg0: i32) -> (i32, i32, i32) {
    %c0_i32 = arith.constant 0 : i32
    %c0_i32_0 = arith.constant 0 : i32
    %c0_i32_1 = arith.constant 0 : i32
    return %arg0, %c0_i32, %c0_i32_0 : i32, i32, i32
  }
  func.func @transform_1(%arg0: i32) -> (i32, i32) {
    %c0_i32 = arith.constant 0 : i32
    %c0_i32_0 = arith.constant 0 : i32
    %c0_i32_1 = arith.constant 0 : i32
    return %c0_i32, %c0_i32_0 : i32, i32
  }
  func.func @transform_2(%arg0: i32) -> (i32, i32) {
    %c0_i32 = arith.constant 0 : i32
    %c0_i32_0 = arith.constant 0 : i32
    %c0_i32_1 = arith.constant 0 : i32
    return %c0_i32, %c0_i32_0 : i32, i32
  }
  func.func @transform_3(%arg0: i32) -> (i32, i32) {
    %c0_i32 = arith.constant 0 : i32
    %c0_i32_0 = arith.constant 0 : i32
    %c0_i32_1 = arith.constant 0 : i32
    return %c0_i32, %c0_i32_0 : i32, i32
  }
  func.func @transform_4(%arg0: i32) -> (i32, i32) {
    %c0_i32 = arith.constant 0 : i32
    %c0_i32_0 = arith.constant 0 : i32
    %c0_i32_1 = arith.constant 0 : i32
    return %c0_i32, %c0_i32_0 : i32, i32
  }
  func.func @transform_5(%arg0: i32) -> (i32, i32) {
    %c0_i32 = arith.constant 0 : i32
    %c0_i32_0 = arith.constant 0 : i32
    %c0_i32_1 = arith.constant 0 : i32
    return %c0_i32, %c0_i32_0 : i32, i32
  }
  func.func @transform_6(%arg0: i32) -> (i32, i32, i32) {
    %c0_i32 = arith.constant 0 : i32
    %c0_i32_0 = arith.constant 0 : i32
    %c0_i32_1 = arith.constant 0 : i32
    return %arg0, %c0_i32, %c0_i32_0 : i32, i32, i32
  }
}

</mosaic_0001>

<bundles_post_ra>
// kernel: tpu_custom_call.1
= control target key start
LH: loop header
LB: loop body
LE: loop exit
PB: predicated region body
PF: predicated region fallthrough
CT: control target
= control target key end

     0   :  { %s1127_s0 = inlined_call_operand.hbm [shape: f32[2,8,23], index: 0, kind: input, shape index: {}]   ;;  %s1128_s1 = inlined_call_operand.hbm [shape: f32[8,32], index: 1, kind: input, shape index: {}]   ;;  %s1129_s2 = inlined_call_operand.hbm [shape: bf16[23,32], index: 2, kind: input, shape index: {}]   ;;  %s1130_s3 = inlined_call_operand.vmem [shape: f32[1,32], index: 3, kind: input, shape index: {}]   ;;  %s1131_s4 = inlined_call_operand.hbm [shape: bf16[32,32], index: 4, kind: input, shape index: {}]   ;;  %s1132_s5 = inlined_call_operand.vmem [shape: f32[1,32], index: 5, kind: input, shape index: {}]   ;;  %s1133_s6 = inlined_call_operand.hbm [shape: f32[2,8,32], index: 6, kind: output, shape index: {}]  }
   0x1   :  { %1138 = sst [smem:[#allocation15_spill]] %s1128_s1 }
   0x2   :  { %11 = vsyncpa [#allocation3], 0 }
   0x3   :  { %13 = vsyncpa [#allocation3 + $0x1], 0 }
   0x4   :  { %14 = vsyncpa [#allocation6], 0 }
   0x5   :  { %15 = vsyncpa [#allocation9], 0 }
   0x6   :  { %16 = vsyncpa [#allocation4], 0 }
   0x7   :  { %18 = vsyncpa [#allocation4 + $0x1], 0  ;;  %s926_s21 = smov 0   ;;  %s928_s22 = smov 0  }
   0x8   :  { %s930_s23 = smov 0   ;;  %s932_s24 = smov 0  }
   0x9 LB: > { %s947_s25 = sadd.s32 4294967295, %s879_s24   ;;  %s567_s26 = sadd.s32 4294967294, %s879_s24   ;;  %s879_s24 = sphi %s932_s24, %s1159_s24   ;;  %s875_s23 = sphi %s930_s23, %s1158_s23   ;;  %s871_s22 = sphi %s928_s22, %s1157_s22   ;;  %s867_s21 = sphi %s926_s21, %s1156_s21  }
   0xa   : > { %p44_p0 = scmp.ne.s32.totalorder %s871_s22, %s867_s21  ;;  %p1134_p1 = scmp.eq.s32.totalorder %s947_s25, 0 }
   0xb   : > { %p179_p3 = scmp.eq.s32.totalorder %s567_s26, 1  ;;  %p568_p5 = scmp.ge.s32.totalorder %s879_s24, 1 }
   0xc   : > { %p956_p4 = por %p1134_p1, %p44_p0  ;;  %p186_p7 = scmp.lt.s32.totalorder %s879_s24, 3 }
   0xd   : > { %p961_p6 = por %p179_p3, %p44_p0  ;;  %s881_s30 = smov [#allocation5]  }
   0xe   : > { %s1139_s27 = scalar_select %p956_p4, 1, 0 }
   0xf   : > { %s1140_s28 = scalar_select %p961_p6, 1, 0 }
  0x10   : > { %p966_p8 = pnand %p568_p5, %p186_p7  ;;  %s199_s7 = sshll.u32 %s881_s30, 4  ;;  %s200_s7 = int_to_ptr.vmem [resolvable:$true] %s199_s7 }
  0x11   : > { %s882_s8 = smov [#allocation7]   ;;  %s883_s11 = smov [#allocation8]  }
  0x12   : > { %s1141_s29 = scalar_select %p966_p8, 1, 0 }
  0x13   : > { %p631_p10 = pneg %p966_p8  ;;  %s209_s9 = sshll.u32 %s882_s8, 4  ;;  %s210_s9 = int_to_ptr.vmem [resolvable:$true] %s209_s9 }
  0x14   : > { %s225_s12 = sshll.u32 %s883_s11, 4  ;;  %s712_s13 = scalar_lea.vmem %s200_s7, 128  ;;  %s226_s12 = int_to_ptr.vmem [resolvable:$true] %s225_s12 }
  0x15   : > { %p975_p11 = pnand %p631_p10, %p1134_p1  ;;  %p713_p13 = scmp.ne.s32.totalorder %s200_s7, %s712_s13 }
  0x16   : > { %p720_p5 = scmp.lt.s32.totalorder %s200_s7, %s200_s7  ;;  %p721_p7 = scmp.lt.s32.totalorder %s712_s13, %s712_s13 }
  0x17   : > { %p703_p12 = pneg %p975_p11 }
  0x18   : > { %p722_p9 = por %p721_p7, %p720_p5 }
  0x19   : > { %p715_p0 = pnand %p713_p13, %p703_p12 }
  0x1b   : > { %p716_p3 = pneg %p715_p0 }
  0x1d   : > { %p723_p10 = pnand %p722_p9, %p716_p3 }
  0x1f   : > { %726 = shalt.err (!%p723_p10)
}
  0x20   : > { %s1143_s1 = sld [smem:[#allocation15_spill]]  ;;  %s738_s16 = scalar_lea.vmem %s210_s9, 192 }
  0x21   : > { %p739_p1 = scmp.ne.s32.totalorder %s210_s9, %s738_s16  ;;  %p746_p13 = scmp.lt.s32.totalorder %s210_s9, %s210_s9 }
  0x22   : > { %p747_p0 = scmp.lt.s32.totalorder %s738_s16, %s738_s16 }
  0x23   : > { %p741_p2 = pnand %p739_p1, %p703_p12 }
  0x24   : > { %p748_p4 = por %p747_p0, %p746_p13 }
  0x25   : > { %p742_p6 = pneg %p741_p2 }
  0x26   : > { %634 = dma.hbm_to_vmem [thread:$0]  (!%p975_p11), %s1143_s1, 128, %s200_s7, [#allocation6]  }
  0x27   : > { %p749_p8 = pnand %p748_p4, %p742_p6 }
  0x29   : > { %752 = shalt.err (!%p749_p8)
}
  0x2a   : > { %s884_s17 = smov 64   ;;  %s885_s18 = smov 4  }
  0x2b   : > { %637 = dma.hbm_to_vmem [thread:$0]  (!%p975_p11), %s1129_s2, 192, %s210_s9, [#allocation6], %s884_s17, %s884_s17, %s885_s18  }
  0x2c   : > { %s764_s26 = scalar_lea.vmem %s226_s12, 256  ;;  %p772_p3 = scmp.lt.s32.totalorder %s226_s12, %s226_s12 }
  0x2d   : > { %p765_p9 = scmp.ne.s32.totalorder %s226_s12, %s764_s26  ;;  %p773_p5 = scmp.lt.s32.totalorder %s764_s26, %s764_s26 }
  0x2f   : > { %p767_p1 = pnand %p765_p9, %p703_p12  ;;  %p774_p4 = por %p773_p5, %p772_p3 }
  0x31   : > { %p768_p2 = pneg %p767_p1 }
  0x33   : > { %p775_p6 = pnand %p774_p4, %p768_p2 }
  0x35   : > { %778 = shalt.err (!%p775_p6)
}
  0x36   : > { %640 = dma.hbm_to_vmem [thread:$0]  (!%p975_p11), %s1131_s4, 256, %s226_s12, [#allocation9], %s884_s17, %s884_s17, %s885_s18  }
  0x37   : > { %s1006_s8 = sadd.s32 1, %s879_s24   ;;  %s31_s10 = sadd.s32 1, %s875_s23 }
  0x38   : > { %s28_s9 = ssub.s32 %s879_s24, %s1006_s8  ;;  %p38_p12 = scmp.ne.s32.totalorder %s875_s23, %s871_s22 }
  0x39   : > { %p29_p8 = scmp.eq.s32.totalorder %s28_s9, 0  ;;  %p39_p7 = scmp.eq.s32.totalorder %s879_s24, 0 }
  0x3a   : > { %p652_p10 = scmp.lt.s32.totalorder %s879_s24, 2  ;;  %p1144_p0 = scmp.eq.s32.totalorder %s947_s25, 1 }
  0x3b   : > { %s1016_s11 = scalar_select %p29_p8, %s875_s23, %s31_s10  }
  0x3c   : > { %p40_p13 = por %p39_p7, %p38_p12  ;;  %p1020_p9 = por %p1144_p0, %p38_p12 }
  0x3d   : > { %s242_s14 = sand.u32 1, %s875_s23   ;;  %s574_s15 = sshll.u32 %s879_s24, 7 }
  0x3e   : > { %s1145_s13 = scalar_select %p1020_p9, 1, 0 }
  0x3f   : > { %s573_s12 = sshll.u32 %s242_s14, 3  ;;  %s1029_s18 = scalar_lea.hbm %s1127_s0, %s574_s15 }
  0x40   : > { %s246_s19 = scalar_lea.vmem [#allocation2], %s573_s12  ;;  %p1031_p11 = pnand %p652_p10, %p40_p13 }
  0x41   : > { %s253_s20 = sshll.u32 %s246_s19, 4  ;;  %s243_s30 = scalar_lea.sflag [#allocation3], %s242_s14  ;;  %s254_s20 = int_to_ptr.vmem [resolvable:$true] %s253_s20 }
  0x42   : > { %s779_s7 = scalar_lea.hbm %s1029_s18, 128  ;;  %p781_p2 = pneg %p1031_p11 }
  0x43   : > { %p780_p1 = scmp.ne.s32.totalorder %s1029_s18, %s779_s7  ;;  %s784_s15 = scalar_lea.hbm %s1127_s0, 256 }
  0x44   : > { %p785_p4 = scmp.lt.s32.totalorder %s1029_s18, %s1127_s0  ;;  %p786_p6 = scmp.lt.s32.totalorder %s784_s15, %s779_s7 }
  0x45   : > { %p782_p3 = pnand %p781_p2, %p780_p1 }
  0x46   : > { %p787_p8 = por %p786_p6, %p785_p4 }
  0x47   : > { %p783_p5 = pneg %p782_p3 }
  0x49   : > { %p788_p12 = pnand %p787_p8, %p783_p5 }
  0x4b   : > { %791 = shalt.err (!%p788_p12)
}
  0x4c   : > { %s792_s17 = scalar_lea.vmem %s254_s20, 128  ;;  %s886_s14 = smov [#allocation2]  }
  0x4d   : > { %p793_p7 = scmp.ne.s32.totalorder %s254_s20, %s792_s17  ;;  %s797_s19 = sshll.u32 %s886_s14, 4  ;;  %s798_s19 = int_to_ptr.vmem [resolvable:$false] %s797_s19 }
  0x4e   : > { %s799_s1 = scalar_lea.vmem %s798_s19, 256  ;;  %p800_p0 = scmp.lt.s32.totalorder %s254_s20, %s798_s19 }
  0x4f   : > { %p795_p10 = pnand %p793_p7, %p781_p2  ;;  %p801_p1 = scmp.lt.s32.totalorder %s799_s1, %s792_s17 }
  0x51   : > { %p796_p13 = pneg %p795_p10  ;;  %p802_p3 = por %p801_p1, %p800_p0 }
  0x53   : > { %p803_p9 = pnand %p802_p3, %p796_p13 }
  0x55   : > { %806 = shalt.err (!%p803_p9)
}
  0x56   : > { %644 = dma.hbm_to_vmem [thread:$0]  (!%p1031_p11), %s1029_s18, 128, %s254_s20, %s243_s30  }
  0x57   : > { %p1147_p5 = scmp.ne.s32.totalorder %s1141_s29, 0 }
  0x58   : > { %s1052_s7 = sand.u32 (!%p1147_p5), 1, %s871_s22   ;;  %p1148_p2 = scmp.ne.s32.totalorder (!%p1147_p5), %s1139_s27, 0 }
  0x59   : > { %262 = sbr.rel (%p1147_p5) target bundleno = 524 (0x20c), region = 44  ;;  %s576_s9 = sshll.u32 (!%p1147_p5), %s1052_s7, 3 }
  0x5a   : > { %s265_s10 = scalar_lea.sflag (!%p1147_p5), [#allocation3], %s1052_s7  ;;  %s268_s1 = scalar_lea.vmem (!%p1147_p5), [#allocation2], %s576_s9 }
  0x5e   : > { %850 = dma.done.wait (%p1148_p2), %s265_s10, 128  }
  0x5f   : > { %852 = vsyncadd (%p1148_p2), %s265_s10, 4294967168  ;;  %p1149_p9 = scmp.eq.s32.totalorder %s947_s25, 0 }
  0x61   : > { %854 = dma.done.wait (%p1149_p9), [#allocation6], 320   ;;  %p1150_p11 = pmov %p1149_p9 }
  0x62   : > { %p1151_p4 = pmov %p1149_p9 }
  0x63   : > { %856 = vsyncadd (%p1150_p11), [#allocation6], 4294966976 }
  0x64   : > { %858 = dma.done.wait (%p1151_p4), [#allocation9], 256   ;;  %p1152_p6 = pmov %p1151_p4 }
  0x65   : > { %vm335_vm0 = vcmask 1042432   ;;  %v887_v0 = vmov 0.0   ;;  %vm888_vm1 = vmmov 0   ;;  %vm336_vm2 = vcmask 1043456   ;;  %v697_v4 = vld [vmem:[#allocation7 + $0x8] ss:$0 sps:$4 sm:$0xff]  }
  0x66   : > { %860 = vsyncadd (%p1152_p6), [#allocation9], 4294967040  ;;  %599 = vmatprep.subr.bf16.mxu0 %v887_v0  ;;  %607 = vmatprep.subr.bf16.mxu1 %v887_v0  ;;  %v889_v1 = vmov 65535   ;;  %v698_v6 = vld [vmem:[#allocation7] sm:$0xff]   ;;  %v310_v7 = vld [vmem:[%s268_s1] sm:$0xff]  ;;  %vm331_vm3 = vcmask 187392  }
  0x67   : > { %603 = vmatprep.mubr.msk.bf16.mxu0 %vm888_vm1, %v887_v0  ;;  %611 = vmatprep.mubr.msk.bf16.mxu1 %vm888_vm1, %v887_v0  ;;  %v337_v2 = vsel %vm335_vm0, 4294967295, %v889_v1  ;;  %v311_v8 = vpack.c.bf16 %v310_v7, %v310_v7  ;;  %v699_v9 = vld [vmem:[#allocation8 + $0x8] sm:$0xff]   ;;  %v700_v10 = vld [vmem:[#allocation8] sm:$0xff]   ;;  %v581_v11 = vld [vmem:[%s1130_s3] ss:$0 sm:$0xff]  ;;  %vm407_vm4 = vcmask 261120  }
  0x68   : > { %v338_v3 = vsel %vm336_vm2, %v337_v2, 0  ;;  %608 = vmatpush3.bf16.msra.mxu1 %v699_v9  ;;  %v585_v19 = vld [vmem:[%s1132_s5] ss:$0 sm:$0xff]  ;;  %v451_v21 = vld [vmem:[#allocation5] sm:$0xff]  ;;  %s590_s26 = sshll.u32 %s947_s25, 7  ;;  %s308_s30 = scalar_lea.vmem [#allocation10], %s576_s9 }
  0x69   : > { %v340_v5 = vand.u32 %v697_v4, %v338_v3  ;;  %609 = vmatprep.subr.bf16.mxu1 %v887_v0  ;;  %s468_s15 = sshll.u32 %s308_s30, 4  ;;  %s1083_s17 = scalar_lea.hbm %s1133_s6, %s590_s26  ;;  %s1085_s15 = int_to_ptr.vmem [resolvable:$true] %s468_s15 }
  0x6a   : > { %s455_s25 = scalar_lea.sflag [#allocation4], %s1052_s7  ;;  %s807_s14 = scalar_lea.vmem %s1085_s15, 128 }
  0x6b   : > { %600 = vmatpush3.bf16.msra.mxu0 %v340_v5  ;;  %p808_p8 = scmp.ne.s32.totalorder %s1085_s15, %s807_s14  ;;  %p1153_p12 = scmp.ne.s32.totalorder %s1145_s13, 0 }
  0x6c   : > { %601 = vmatprep.subr.bf16.mxu0 %v887_v0  ;;  %610 = vmatpush3.bf16.msra.mxu1 %v700_v10  ;;  %s890_s19 = smov [#allocation10]  }
  0x6d   : > { %p809_p7 = pnand %p808_p8, %p1153_p12  ;;  %s811_s9 = sshll.u32 %s890_s19, 4  ;;  %s812_s9 = int_to_ptr.vmem [resolvable:$false] %s811_s9 }
  0x6e   : > { %s813_s10 = scalar_lea.vmem %s812_s9, 256  ;;  %p814_p13 = scmp.lt.s32.totalorder %s1085_s15, %s812_s9 }
  0x6f   : > { %602 = vmatpush3.bf16.msra.mxu0 %v698_v6  ;;  %p810_p10 = pneg %p809_p7  ;;  %p815_p0 = scmp.lt.s32.totalorder %s813_s10, %s807_s14 }
  0x71   : > { %p816_p1 = por %p815_p0, %p814_p13 }
  0x72   : > { %604 = vmatmul.mubr.msk.bf16.vlgmr.msra.gmra.mxu0 %vm331_vm3, %v311_v8 }
  0x73   : > { %p817_p3 = pnand %p816_p1, %p810_p10 }
 0x132   : > { %v376_v12 = vpop.f32.mrf.mxu0 }
 0x133   : > { %v377_v13 = vadd.f32 %v581_v11, %v376_v12 }
 0x134   : > { %v605_v14 = vpop.f32.mrf.mxu0 }
 0x135   : > { %v382_v15 = vmax.f32 %v377_v13, 0.0 }
 0x136   : > { %v379_v16 = vpop.f32.mrf.mxu0 }
 0x137   : > { %v383_v17 = vpack.c.bf16 %v382_v15, %v382_v15 }
 0x138   : > { %v606_v18 = vpop.f32.mrf.mxu0 }
 0x139   : > { %612 = vmatmul.mubr.msk.bf16.vlgmr.msra.gmra.mxu1 %vm407_vm4, %v383_v17 }
 0x1f9   : > { %v445_v20 = vpop.f32.mrf.mxu1 }
 0x1fa   : > { %v446_v22 = vadd.f32 %v585_v19, %v445_v20 }
 0x1fb   : > { %v613_v23 = vpop.f32.mrf.mxu1 }
 0x1fc   : > { %v452_v24 = vadd.f32 %v451_v21, %v446_v22 }
 0x1fd   : > { %v448_v25 = vpop.f32.mrf.mxu1 }
 0x1fe   : > { %453 = vst.msk [vmem:[%s308_s30] sm:$0xff] %vm407_vm4, %v452_v24 }
 0x1ff   : > { %v614_v26 = vpop.f32.mrf.mxu1 }
 0x200   : > { %820 = shalt.err (!%p817_p3)
}
 0x201   : > { %s821_s1 = scalar_lea.hbm %s1083_s17, 128  ;;  %s825_s29 = scalar_lea.hbm %s1133_s6, 256 }
 0x202   : > { %p822_p5 = scmp.ne.s32.totalorder %s1083_s17, %s821_s1  ;;  %p826_p11 = scmp.lt.s32.totalorder %s1083_s17, %s1133_s6 }
 0x203   : > { %p827_p4 = scmp.lt.s32.totalorder %s825_s29, %s821_s1 }
 0x204   : > { %p823_p2 = pnand %p822_p5, %p1153_p12 }
 0x205   : > { %p828_p6 = por %p827_p4, %p826_p11 }
 0x206   : > { %p824_p9 = pneg %p823_p2 }
 0x208   : > { %p829_p8 = pnand %p828_p6, %p824_p9 }
 0x20a   : > { %832 = shalt.err (!%p829_p8)
}
 0x20b   : > { %629 = dma.vmem_to_hbm [thread:$0]  (%p1153_p12), %s1085_s15, 128, %s1083_s17, %s455_s25  }
 0x20c PF: > { %s480_s26 = sand.u32 1, %s867_s21   ;;  %p1154_p7 = scmp.ne.s32.totalorder %s1140_s28, 0 }
 0x20d   : > { %p1155_p10 = scmp.ge.s32.totalorder %s879_s24, 2  ;;  %s481_s30 = scalar_lea.sflag [#allocation4], %s480_s26 }
 0x20f   : > { %p646_p13 = pnand %p1155_p10, %p1154_p7 }
 0x211   : > { %p647_p0 = pneg %p646_p13 }
 0x213   : > { %862 = dma.done.wait (%p647_p0), %s481_s30, 128  }
 0x214   : > { %864 = vsyncadd (%p647_p0), %s481_s30, 4294967168  ;;  %p21_p1 = scmp.ge.s32.totalorder %s1006_s8, 4   ;;  %s1156_s21 = smov %s871_s22 }
 0x215   : > { %s1157_s22 = smov %s875_s23  ;;  %s1158_s23 = smov %s1016_s11 }
 0x216   : > { %s1159_s24 = smov %s1006_s8  ;;  %23 = sbr.rel (!%p21_p1) target bundleno = 9 (0x9), region = 101 }
 0x21b   :  { %486 = vsyncpa [#allocation3], 1 }
 0x21c   :  { %488 = vsyncpa [#allocation3 + $0x1], 1 }
 0x21d   :  { %489 = vsyncpa [#allocation6], 1 }
 0x21e   :  { %490 = vsyncpa [#allocation9], 1 }
 0x21f   :  { %491 = vsyncpa [#allocation4], 1 }
 0x220   :  { %493 = vsyncpa [#allocation4 + $0x1], 1 }

</bundles_post_ra>
